<compile_context>
chip_gen: v6e
topology: v6e:2x2x1
jax: 0.10.0
libtpu: 0.0.40
codegen_flags: <defaults>
</compile_context>

<pallas_src>
import jax
import jax.numpy as jnp
from jax.experimental import pallas as pl
from jax.experimental.pallas import tpu as pltpu

_LANE = 128


def _round_up(v, m):
    return (v + m - 1) // m * m


def _gelu_exact(x):
    # PyTorch nn.GELU() default: exact erf-based GELU.
    return 0.5 * x * (1.0 + jax.lax.erf(x * 0.7071067811865476))


def csi_gan_kernel(
    x_ref,
    # action_net params (head weight/bias zero-padded to 128 output lanes)
    a_w1, a_b1, a_w2, a_b2, a_whp, a_bhp,
    # domain_net params; first-layer weight is split into x-rows (d_w1x) and
    # action-logit rows zero-padded to 128 rows (d_w1a) so the concat never exists.
    d_w1x, d_w1a, d_b1, d_w2, d_b2, d_whp, d_bhp,
    # outputs: lane-dense (TM, 128) slabs
    action_out_ref, domain_out_ref,
):
    x = x_ref[...]

    # ---- action_net: Linear -> GELU -> (Dropout = eval identity) -> Linear -> GELU -> head ----
    h = _gelu_exact(jnp.dot(x, a_w1[...], preferred_element_type=jnp.float32) + a_b1[...])
    h = _gelu_exact(jnp.dot(h, a_w2[...], preferred_element_type=jnp.float32) + a_b2[...])
    # (TM, 128); lanes >= action_num are exactly zero because the head pad is zero.
    a_logits = jnp.dot(h, a_whp[...], preferred_element_type=jnp.float32) + a_bhp[...]
    action_out_ref[...] = a_logits.astype(action_out_ref.dtype)

    # ---- domain_net on concat([x, action_logits], -1), expressed as split matmuls ----
    # x @ d_w1x + a_logits_padded @ d_w1a_padded == concat([x, action_logits]) @ d_w1
    g = _gelu_exact(
        jnp.dot(x, d_w1x[...], preferred_element_type=jnp.float32)
        + jnp.dot(a_logits, d_w1a[...], preferred_element_type=jnp.float32)
        + d_b1[...]
    )
    g = _gelu_exact(jnp.dot(g, d_w2[...], preferred_element_type=jnp.float32) + d_b2[...])
    d_logits = jnp.dot(g, d_whp[...], preferred_element_type=jnp.float32) + d_bhp[...]
    domain_out_ref[...] = d_logits.astype(domain_out_ref.dtype)


def csi_gan_forward(x, a_params, d_params, action_num, domain_num, *, tm=None):
    """Runs the fused action/domain head kernel.

    x: (B, d_llm) extracted features. Returns (action_logits (B, action_num),
    domain_logits (B, domain_num)).
    """
    B, d_llm = x.shape
    a_w1, a_b1, a_w2, a_b2, a_wh, a_bh = a_params
    d_w1, d_b1, d_w2, d_b2, d_wh, d_bh = d_params

    # --- lane-dense heads: zero-pad head output dim to 128 lanes ---
    a_whp = jnp.pad(a_wh, ((0, 0), (0, _LANE - action_num)))
    a_bhp = jnp.pad(a_bh, ((0, 0), (0, _LANE - action_num)))
    d_whp = jnp.pad(d_wh, ((0, 0), (0, _LANE - domain_num)))
    d_bhp = jnp.pad(d_bh, ((0, 0), (0, _LANE - domain_num)))

    # --- split the domain first-layer weight to remove the lane-axis concat ---
    d_w1x = d_w1[:d_llm, :]
    d_w1a = jnp.pad(d_w1[d_llm:, :], ((0, _LANE - action_num), (0, 0)))

    # --- batch tiling: pad B up to a multiple of the tile ---
    if tm is None:
        tm = min(128, _round_up(B, 8))  # 128-row tiles once B is big (MXU height on v5e)
    Bp = _round_up(B, tm)
    if Bp != B:
        x = jnp.pad(x, ((0, Bp - B), (0, 0)))
    grid = (Bp // tm,)

    weights = (a_w1, a_b1, a_w2, a_b2, a_whp, a_bhp,
               d_w1x, d_w1a, d_b1, d_w2, d_b2, d_whp, d_bhp)

    def full_spec(w):
        # Whole-weight VMEM-resident block: same block index for every grid step.
        return pl.BlockSpec(w.shape, lambda i: (0, 0))

    in_specs = [pl.BlockSpec((tm, d_llm), lambda i: (i, 0))] + [full_spec(w) for w in weights]
    out_specs = (
        pl.BlockSpec((tm, _LANE), lambda i: (i, 0)),
        pl.BlockSpec((tm, _LANE), lambda i: (i, 0)),
    )

    action_p, domain_p = pl.pallas_call(
        csi_gan_kernel,
        grid=grid,
        in_specs=in_specs,
        out_specs=out_specs,
        out_shape=(
            jax.ShapeDtypeStruct((Bp, _LANE), jnp.float32),
            jax.ShapeDtypeStruct((Bp, _LANE), jnp.float32),
        ),
        compiler_params=pltpu.CompilerParams(
            dimension_semantics=("parallel",),  # v7x: shard batch tiles over both TCs
        ),
    )(x, *weights)

    # Slice the lane-dense slabs back to the true logit widths (and true batch).
    return action_p[:B, :action_num], domain_p[:B, :domain_num]


def make_recnet_params(key, in_dim, embed_size, num_classes):
    """RecNet: Linear(in,4e) GELU Dropout Linear(4e,e) GELU ; head Linear(e,classes)."""
    ks = jax.random.split(key, 6)
    s = 0.02
    w1 = s * jax.random.normal(ks[0], (in_dim, embed_size * 4), jnp.float32)
    b1 = s * jax.random.normal(ks[1], (1, embed_size * 4), jnp.float32)
    w2 = s * jax.random.normal(ks[2], (embed_size * 4, embed_size), jnp.float32)
    b2 = s * jax.random.normal(ks[3], (1, embed_size), jnp.float32)
    wh = s * jax.random.normal(ks[4], (embed_size, num_classes), jnp.float32)
    bh = s * jax.random.normal(ks[5], (1, num_classes), jnp.float32)
    return (w1, b1, w2, b2, wh, bh)


if __name__ == "__main__":
    # Small, forward-consistent shapes.
    batch = 8
    d_llm = 32          # feature_extracter.d_llm
    action_num = 8
    domain_num = 4

    root = jax.random.PRNGKey(0)
    kx, ka, kd = jax.random.split(root, 3)

    # Extracted features (stand-in for build_LLM2Rec output): (B, d_llm)
    x = jax.random.normal(kx, (batch, d_llm), jnp.float32)

    # action_net: RecNet(action_num, d_llm)
    a_params = make_recnet_params(ka, d_llm, d_llm, action_num)
    # domain_net: RecNet(domain_num, d_llm + action_num)
    d_embed = d_llm + action_num
    d_params = make_recnet_params(kd, d_embed, d_embed, domain_num)

    action_logits, domain_logits = csi_gan_forward(
        x, a_params, d_params, action_num, domain_num)
    jax.block_until_ready((action_logits, domain_logits))

    # Pure-JAX reference (mirrors the PyTorch forward with eval-mode dropout).
    aw1, ab1, aw2, ab2, awh, abh = a_params
    dw1, db1, dw2, db2, dwh, dbh = d_params
    h = _gelu_exact(_gelu_exact(x @ aw1 + ab1) @ aw2 + ab2)
    a_ref = h @ awh + abh
    din = jnp.concatenate([x, a_ref], axis=-1)
    g = _gelu_exact(_gelu_exact(din @ dw1 + db1) @ dw2 + db2)
    d_ref = g @ dwh + dbh

    assert action_logits.shape == (batch, action_num)
    assert domain_logits.shape == (batch, domain_num)
    assert jnp.allclose(action_logits, a_ref, atol=1e-4, rtol=1e-4)
    assert jnp.allclose(domain_logits, d_ref, atol=1e-4, rtol=1e-4)

    print("KERNEL_OK")
</pallas_src>

<mosaic_0001>
module attributes {stable_mosaic.version = 11 : i64} {
  func.func @csi_gan_kernel(%arg0: i32, %arg1: memref<8x32xf32, #tpu.memory_space<vmem>>, %arg2: memref<32x128xf32, #tpu.memory_space<vmem>>, %arg3: memref<1x128xf32, #tpu.memory_space<vmem>>, %arg4: memref<128x32xf32, #tpu.memory_space<vmem>>, %arg5: memref<1x32xf32, #tpu.memory_space<vmem>>, %arg6: memref<32x128xf32, #tpu.memory_space<vmem>>, %arg7: memref<1x128xf32, #tpu.memory_space<vmem>>, %arg8: memref<32x160xf32, #tpu.memory_space<vmem>>, %arg9: memref<128x160xf32, #tpu.memory_space<vmem>>, %arg10: memref<1x160xf32, #tpu.memory_space<vmem>>, %arg11: memref<160x40xf32, #tpu.memory_space<vmem>>, %arg12: memref<1x40xf32, #tpu.memory_space<vmem>>, %arg13: memref<40x128xf32, #tpu.memory_space<vmem>>, %arg14: memref<1x128xf32, #tpu.memory_space<vmem>>, %arg15: memref<8x128xf32, #tpu.memory_space<vmem>>, %arg16: memref<8x128xf32, #tpu.memory_space<vmem>>) attributes {dimension_semantics = [#tpu.dimension_semantics<parallel>], iteration_bounds = array<i64: 1>, scalar_prefetch = 0 : i64, scratch_operands = 0 : i64, tpu.core_type = #tpu.core_type<tc>, window_params = [{transform_indices = @transform_0, window_bounds = array<i64: 8, 32>}, {pipeline_mode = #tpu.pipeline_mode<synchronous>, transform_indices = @transform_1, window_bounds = array<i64: 32, 128>}, {pipeline_mode = #tpu.pipeline_mode<synchronous>, transform_indices = @transform_2, window_bounds = array<i64: 1, 128>}, {pipeline_mode = #tpu.pipeline_mode<synchronous>, transform_indices = @transform_3, window_bounds = array<i64: 128, 32>}, {pipeline_mode = #tpu.pipeline_mode<synchronous>, transform_indices = @transform_4, window_bounds = array<i64: 1, 32>}, {pipeline_mode = #tpu.pipeline_mode<synchronous>, transform_indices = @transform_5, window_bounds = array<i64: 32, 128>}, {pipeline_mode = #tpu.pipeline_mode<synchronous>, transform_indices = @transform_6, window_bounds = array<i64: 1, 128>}, {pipeline_mode = #tpu.pipeline_mode<synchronous>, transform_indices = @transform_7, window_bounds = array<i64: 32, 160>}, {pipeline_mode = #tpu.pipeline_mode<synchronous>, transform_indices = @transform_8, window_bounds = array<i64: 128, 160>}, {pipeline_mode = #tpu.pipeline_mode<synchronous>, transform_indices = @transform_9, window_bounds = array<i64: 1, 160>}, {pipeline_mode = #tpu.pipeline_mode<synchronous>, transform_indices = @transform_10, window_bounds = array<i64: 160, 40>}, {pipeline_mode = #tpu.pipeline_mode<synchronous>, transform_indices = @transform_11, window_bounds = array<i64: 1, 40>}, {pipeline_mode = #tpu.pipeline_mode<synchronous>, transform_indices = @transform_12, window_bounds = array<i64: 40, 128>}, {pipeline_mode = #tpu.pipeline_mode<synchronous>, transform_indices = @transform_13, window_bounds = array<i64: 1, 128>}, {transform_indices = @transform_14, window_bounds = array<i64: 8, 128>}, {transform_indices = @transform_15, window_bounds = array<i64: 8, 128>}]} {
    %c0 = arith.constant 0 : index
    %c0_0 = arith.constant 0 : index
    %0 = vector.load %arg1[%c0, %c0_0] : memref<8x32xf32, #tpu.memory_space<vmem>>, vector<8x32xf32>
    %c0_1 = arith.constant 0 : index
    %c0_2 = arith.constant 0 : index
    %1 = vector.load %arg2[%c0_1, %c0_2] : memref<32x128xf32, #tpu.memory_space<vmem>>, vector<32x128xf32>
    %cst = arith.constant dense<0.000000e+00> : vector<8x128xf32>
    %2 = tpu.matmul %0, %1, %cst {dimension_numbers = #tpu.dot_dimension_numbers<[1], [0], [0], [1], [0, 0, 1, 1], [], []>} : vector<8x32xf32>, vector<32x128xf32>, vector<8x128xf32> -> vector<8x128xf32>
    %c0_3 = arith.constant 0 : index
    %c0_4 = arith.constant 0 : index
    %3 = vector.load %arg3[%c0_3, %c0_4] : memref<1x128xf32, #tpu.memory_space<vmem>>, vector<1x128xf32>
    %4 = vector.broadcast %3 : vector<1x128xf32> to vector<8x128xf32>
    %5 = arith.addf %2, %4 : vector<8x128xf32>
    %cst_5 = arith.constant 5.000000e-01 : f32
    %6 = vector.broadcast %cst_5 : f32 to vector<8x128xf32>
    %7 = arith.mulf %6, %5 : vector<8x128xf32>
    %cst_6 = arith.constant 0.707106769 : f32
    %8 = vector.broadcast %cst_6 : f32 to vector<8x128xf32>
    %9 = arith.mulf %5, %8 : vector<8x128xf32>
    %10 = math.erf %9 : vector<8x128xf32>
    %cst_7 = arith.constant 1.000000e+00 : f32
    %11 = vector.broadcast %cst_7 : f32 to vector<8x128xf32>
    %12 = arith.addf %11, %10 : vector<8x128xf32>
    %13 = arith.mulf %7, %12 : vector<8x128xf32>
    %c0_8 = arith.constant 0 : index
    %c0_9 = arith.constant 0 : index
    %14 = vector.load %arg4[%c0_8, %c0_9] : memref<128x32xf32, #tpu.memory_space<vmem>>, vector<128x32xf32>
    %cst_10 = arith.constant dense<0.000000e+00> : vector<8x32xf32>
    %15 = tpu.matmul %13, %14, %cst_10 {dimension_numbers = #tpu.dot_dimension_numbers<[1], [0], [0], [1], [0, 0, 1, 1], [], []>} : vector<8x128xf32>, vector<128x32xf32>, vector<8x32xf32> -> vector<8x32xf32>
    %c0_11 = arith.constant 0 : index
    %c0_12 = arith.constant 0 : index
    %16 = vector.load %arg5[%c0_11, %c0_12] : memref<1x32xf32, #tpu.memory_space<vmem>>, vector<1x32xf32>
    %17 = vector.broadcast %16 : vector<1x32xf32> to vector<8x32xf32>
    %18 = arith.addf %15, %17 : vector<8x32xf32>
    %cst_13 = arith.constant 5.000000e-01 : f32
    %19 = vector.broadcast %cst_13 : f32 to vector<8x32xf32>
    %20 = arith.mulf %19, %18 : vector<8x32xf32>
    %cst_14 = arith.constant 0.707106769 : f32
    %21 = vector.broadcast %cst_14 : f32 to vector<8x32xf32>
    %22 = arith.mulf %18, %21 : vector<8x32xf32>
    %23 = math.erf %22 : vector<8x32xf32>
    %cst_15 = arith.constant 1.000000e+00 : f32
    %24 = vector.broadcast %cst_15 : f32 to vector<8x32xf32>
    %25 = arith.addf %24, %23 : vector<8x32xf32>
    %26 = arith.mulf %20, %25 : vector<8x32xf32>
    %c0_16 = arith.constant 0 : index
    %c0_17 = arith.constant 0 : index
    %27 = vector.load %arg6[%c0_16, %c0_17] : memref<32x128xf32, #tpu.memory_space<vmem>>, vector<32x128xf32>
    %cst_18 = arith.constant dense<0.000000e+00> : vector<8x128xf32>
    %28 = tpu.matmul %26, %27, %cst_18 {dimension_numbers = #tpu.dot_dimension_numbers<[1], [0], [0], [1], [0, 0, 1, 1], [], []>} : vector<8x32xf32>, vector<32x128xf32>, vector<8x128xf32> -> vector<8x128xf32>
    %c0_19 = arith.constant 0 : index
    %c0_20 = arith.constant 0 : index
    %29 = vector.load %arg7[%c0_19, %c0_20] : memref<1x128xf32, #tpu.memory_space<vmem>>, vector<1x128xf32>
    %30 = vector.broadcast %29 : vector<1x128xf32> to vector<8x128xf32>
    %31 = arith.addf %28, %30 : vector<8x128xf32>
    %c0_21 = arith.constant 0 : index
    %c0_22 = arith.constant 0 : index
    %32 = vector.load %arg15[%c0_21, %c0_22] : memref<8x128xf32, #tpu.memory_space<vmem>>, vector<8x128xf32>
    tpu.vector_store %arg15[%c0_21, %c0_22], %31 {strides = array<i32>} : memref<8x128xf32, #tpu.memory_space<vmem>>, vector<8x128xf32>,
    %c0_23 = arith.constant 0 : index
    %c0_24 = arith.constant 0 : index
    %33 = vector.load %arg8[%c0_23, %c0_24] : memref<32x160xf32, #tpu.memory_space<vmem>>, vector<32x160xf32>
    %cst_25 = arith.constant dense<0.000000e+00> : vector<8x160xf32>
    %34 = tpu.matmul %0, %33, %cst_25 {dimension_numbers = #tpu.dot_dimension_numbers<[1], [0], [0], [1], [0, 0, 1, 1], [], []>} : vector<8x32xf32>, vector<32x160xf32>, vector<8x160xf32> -> vector<8x160xf32>
    %c0_26 = arith.constant 0 : index
    %c0_27 = arith.constant 0 : index
    %35 = vector.load %arg9[%c0_26, %c0_27] : memref<128x160xf32, #tpu.memory_space<vmem>>, vector<128x160xf32>
    %cst_28 = arith.constant dense<0.000000e+00> : vector<8x160xf32>
    %36 = tpu.matmul %31, %35, %cst_28 {dimension_numbers = #tpu.dot_dimension_numbers<[1], [0], [0], [1], [0, 0, 1, 1], [], []>} : vector<8x128xf32>, vector<128x160xf32>, vector<8x160xf32> -> vector<8x160xf32>
    %37 = arith.addf %34, %36 : vector<8x160xf32>
    %c0_29 = arith.constant 0 : index
    %c0_30 = arith.constant 0 : index
    %38 = vector.load %arg10[%c0_29, %c0_30] : memref<1x160xf32, #tpu.memory_space<vmem>>, vector<1x160xf32>
    %39 = vector.broadcast %38 : vector<1x160xf32> to vector<8x160xf32>
    %40 = arith.addf %37, %39 : vector<8x160xf32>
    %cst_31 = arith.constant 5.000000e-01 : f32
    %41 = vector.broadcast %cst_31 : f32 to vector<8x160xf32>
    %42 = arith.mulf %41, %40 : vector<8x160xf32>
    %cst_32 = arith.constant 0.707106769 : f32
    %43 = vector.broadcast %cst_32 : f32 to vector<8x160xf32>
    %44 = arith.mulf %40, %43 : vector<8x160xf32>
    %45 = math.erf %44 : vector<8x160xf32>
    %cst_33 = arith.constant 1.000000e+00 : f32
    %46 = vector.broadcast %cst_33 : f32 to vector<8x160xf32>
    %47 = arith.addf %46, %45 : vector<8x160xf32>
    %48 = arith.mulf %42, %47 : vector<8x160xf32>
    %c0_34 = arith.constant 0 : index
    %c0_35 = arith.constant 0 : index
    %49 = vector.load %arg11[%c0_34, %c0_35] : memref<160x40xf32, #tpu.memory_space<vmem>>, vector<160x40xf32>
    %cst_36 = arith.constant dense<0.000000e+00> : vector<8x40xf32>
    %50 = tpu.matmul %48, %49, %cst_36 {dimension_numbers = #tpu.dot_dimension_numbers<[1], [0], [0], [1], [0, 0, 1, 1], [], []>} : vector<8x160xf32>, vector<160x40xf32>, vector<8x40xf32> -> vector<8x40xf32>
    %c0_37 = arith.constant 0 : index
    %c0_38 = arith.constant 0 : index
    %51 = vector.load %arg12[%c0_37, %c0_38] : memref<1x40xf32, #tpu.memory_space<vmem>>, vector<1x40xf32>
    %52 = vector.broadcast %51 : vector<1x40xf32> to vector<8x40xf32>
    %53 = arith.addf %50, %52 : vector<8x40xf32>
    %cst_39 = arith.constant 5.000000e-01 : f32
    %54 = vector.broadcast %cst_39 : f32 to vector<8x40xf32>
    %55 = arith.mulf %54, %53 : vector<8x40xf32>
    %cst_40 = arith.constant 0.707106769 : f32
    %56 = vector.broadcast %cst_40 : f32 to vector<8x40xf32>
    %57 = arith.mulf %53, %56 : vector<8x40xf32>
    %58 = math.erf %57 : vector<8x40xf32>
    %cst_41 = arith.constant 1.000000e+00 : f32
    %59 = vector.broadcast %cst_41 : f32 to vector<8x40xf32>
    %60 = arith.addf %59, %58 : vector<8x40xf32>
    %61 = arith.mulf %55, %60 : vector<8x40xf32>
    %c0_42 = arith.constant 0 : index
    %c0_43 = arith.constant 0 : index
    %62 = vector.load %arg13[%c0_42, %c0_43] : memref<40x128xf32, #tpu.memory_space<vmem>>, vector<40x128xf32>
    %cst_44 = arith.constant dense<0.000000e+00> : vector<8x128xf32>
    %63 = tpu.matmul %61, %62, %cst_44 {dimension_numbers = #tpu.dot_dimension_numbers<[1], [0], [0], [1], [0, 0, 1, 1], [], []>} : vector<8x40xf32>, vector<40x128xf32>, vector<8x128xf32> -> vector<8x128xf32>
    %c0_45 = arith.constant 0 : index
    %c0_46 = arith.constant 0 : index
    %64 = vector.load %arg14[%c0_45, %c0_46] : memref<1x128xf32, #tpu.memory_space<vmem>>, vector<1x128xf32>
    %65 = vector.broadcast %64 : vector<1x128xf32> to vector<8x128xf32>
    %66 = arith.addf %63, %65 : vector<8x128xf32>
    %c0_47 = arith.constant 0 : index
    %c0_48 = arith.constant 0 : index
    %67 = vector.load %arg16[%c0_47, %c0_48] : memref<8x128xf32, #tpu.memory_space<vmem>>, vector<8x128xf32>
    tpu.vector_store %arg16[%c0_47, %c0_48], %66 {strides = array<i32>} : memref<8x128xf32, #tpu.memory_space<vmem>>, vector<8x128xf32>,
    return
  }
  func.func @transform_0(%arg0: i32) -> (i32, i32) {
    %c0_i32 = arith.constant 0 : i32
    %c0_i32_0 = arith.constant 0 : i32
    return %arg0, %c0_i32 : i32, i32
  }
  func.func @transform_1(%arg0: i32) -> (i32, i32) {
    %c0_i32 = arith.constant 0 : i32
    %c0_i32_0 = arith.constant 0 : i32
    %c0_i32_1 = arith.constant 0 : i32
    return %c0_i32, %c0_i32_0 : i32, i32
  }
  func.func @transform_2(%arg0: i32) -> (i32, i32) {
    %c0_i32 = arith.constant 0 : i32
    %c0_i32_0 = arith.constant 0 : i32
    %c0_i32_1 = arith.constant 0 : i32
    return %c0_i32, %c0_i32_0 : i32, i32
  }
  func.func @transform_3(%arg0: i32) -> (i32, i32) {
    %c0_i32 = arith.constant 0 : i32
    %c0_i32_0 = arith.constant 0 : i32
    %c0_i32_1 = arith.constant 0 : i32
    return %c0_i32, %c0_i32_0 : i32, i32
  }
  func.func @transform_4(%arg0: i32) -> (i32, i32) {
    %c0_i32 = arith.constant 0 : i32
    %c0_i32_0 = arith.constant 0 : i32
    %c0_i32_1 = arith.constant 0 : i32
    return %c0_i32, %c0_i32_0 : i32, i32
  }
  func.func @transform_5(%arg0: i32) -> (i32, i32) {
    %c0_i32 = arith.constant 0 : i32
    %c0_i32_0 = arith.constant 0 : i32
    %c0_i32_1 = arith.constant 0 : i32
    return %c0_i32, %c0_i32_0 : i32, i32
  }
  func.func @transform_6(%arg0: i32) -> (i32, i32) {
    %c0_i32 = arith.constant 0 : i32
    %c0_i32_0 = arith.constant 0 : i32
    %c0_i32_1 = arith.constant 0 : i32
    return %c0_i32, %c0_i32_0 : i32, i32
  }
  func.func @transform_7(%arg0: i32) -> (i32, i32) {
    %c0_i32 = arith.constant 0 : i32
    %c0_i32_0 = arith.constant 0 : i32
    %c0_i32_1 = arith.constant 0 : i32
    return %c0_i32, %c0_i32_0 : i32, i32
  }
  func.func @transform_8(%arg0: i32) -> (i32, i32) {
    %c0_i32 = arith.constant 0 : i32
    %c0_i32_0 = arith.constant 0 : i32
    %c0_i32_1 = arith.constant 0 : i32
    return %c0_i32, %c0_i32_0 : i32, i32
  }
  func.func @transform_9(%arg0: i32) -> (i32, i32) {
    %c0_i32 = arith.constant 0 : i32
    %c0_i32_0 = arith.constant 0 : i32
    %c0_i32_1 = arith.constant 0 : i32
    return %c0_i32, %c0_i32_0 : i32, i32
  }
  func.func @transform_10(%arg0: i32) -> (i32, i32) {
    %c0_i32 = arith.constant 0 : i32
    %c0_i32_0 = arith.constant 0 : i32
    %c0_i32_1 = arith.constant 0 : i32
    return %c0_i32, %c0_i32_0 : i32, i32
  }
  func.func @transform_11(%arg0: i32) -> (i32, i32) {
    %c0_i32 = arith.constant 0 : i32
    %c0_i32_0 = arith.constant 0 : i32
    %c0_i32_1 = arith.constant 0 : i32
    return %c0_i32, %c0_i32_0 : i32, i32
  }
  func.func @transform_12(%arg0: i32) -> (i32, i32) {
    %c0_i32 = arith.constant 0 : i32
    %c0_i32_0 = arith.constant 0 : i32
    %c0_i32_1 = arith.constant 0 : i32
    return %c0_i32, %c0_i32_0 : i32, i32
  }
  func.func @transform_13(%arg0: i32) -> (i32, i32) {
    %c0_i32 = arith.constant 0 : i32
    %c0_i32_0 = arith.constant 0 : i32
    %c0_i32_1 = arith.constant 0 : i32
    return %c0_i32, %c0_i32_0 : i32, i32
  }
  func.func @transform_14(%arg0: i32) -> (i32, i32) {
    %c0_i32 = arith.constant 0 : i32
    %c0_i32_0 = arith.constant 0 : i32
    return %arg0, %c0_i32 : i32, i32
  }
  func.func @transform_15(%arg0: i32) -> (i32, i32) {
    %c0_i32 = arith.constant 0 : i32
    %c0_i32_0 = arith.constant 0 : i32
    return %arg0, %c0_i32 : i32, i32
  }
}

</mosaic_0001>

<bundles_post_ra>
// kernel: tpu_custom_call.1
= control target key start
LH: loop header
LB: loop body
LE: loop exit
PB: predicated region body
PF: predicated region fallthrough
CT: control target
= control target key end

     0   :  { %21 = vsyncpa [#allocation3], 0  ;;  %v922_v1 = vmov 0.0   ;;  %vm923_vm0 = vmmov 0   ;;  %s1367_s0 = inlined_call_operand.vmem [shape: f32[8,32], index: 0, kind: input, shape index: {}]   ;;  %s1368_s1 = inlined_call_operand.vmem [shape: f32[32,128], index: 1, kind: input, shape index: {}]   ;;  %s1369_s2 = inlined_call_operand.vmem [shape: f32[1,128], index: 2, kind: input, shape index: {}]   ;;  %s1370_s3 = inlined_call_operand.vmem [shape: f32[128,32], index: 3, kind: input, shape index: {}]   ;;  %s1371_s4 = inlined_call_operand.vmem [shape: f32[1,32], index: 4, kind: input, shape index: {}]   ;;  %s1372_s5 = inlined_call_operand.vmem [shape: f32[32,128], index: 5, kind: input, shape index: {}]   ;;  %s1373_s6 = inlined_call_operand.vmem [shape: f32[1,128], index: 6, kind: input, shape index: {}]   ;;  %s1374_s7 = inlined_call_operand.vmem [shape: f32[32,160], index: 7, kind: input, shape index: {}]   ;;  %s1375_s8 = inlined_call_operand.vmem [shape: f32[128,160], index: 8, kind: input, shape index: {}]   ;;  %s1376_s9 = inlined_call_operand.vmem [shape: f32[1,160], index: 9, kind: input, shape index: {}]   ;;  %s1377_s10 = inlined_call_operand.vmem [shape: f32[160,40], index: 10, kind: input, shape index: {}]   ;;  %s1378_s11 = inlined_call_operand.vmem [shape: f32[1,40], index: 11, kind: input, shape index: {}]   ;;  %s1379_s12 = inlined_call_operand.vmem [shape: f32[40,128], index: 12, kind: input, shape index: {}]   ;;  %s1380_s13 = inlined_call_operand.vmem [shape: f32[1,128], index: 13, kind: input, shape index: {}]   ;;  %s1381_s14 = inlined_call_operand.hbm [shape: f32[8,128], index: 14, kind: output, shape index: {0}]   ;;  %s1382_s15 = inlined_call_operand.hbm [shape: f32[8,128], index: 15, kind: output, shape index: {1}]  }
   0x1   :  { %v55_v0 = vld [vmem:[%s1368_s1 + $0x18] sm:$0xff]  ;;  %794 = vmatprep.subr.mxu0 %v922_v1  ;;  %v54_v2 = vld [vmem:[%s1368_s1 + $0x10] sm:$0xff]  ;;  %802 = vmatprep.mubr.msk.f32.mxu0 %vm923_vm0, %v922_v1  ;;  %v53_v5 = vld [vmem:[%s1368_s1 + $0x8] sm:$0xff] }
   0x2   :  { %v157_v3 = vld [vmem:[%s1370_s3 + $0x78] sm:$0xff]  ;;  %795 = vmatpush3.msra.mxu0 %v55_v0  ;;  %805 = vmatprep.subr.mxu1 %v922_v1  ;;  %v156_v4 = vld [vmem:[%s1370_s3 + $0x70] sm:$0xff] }
   0x3   :  { %796 = vmatprep.subr.mxu0 %v922_v1  ;;  %806 = vmatpush3.msra.mxu1 %v157_v3 }
   0x4   :  { %22 = vsyncpa [#allocation5], 0  ;;  %797 = vmatpush3.msra.mxu0 %v54_v2  ;;  %807 = vmatprep.subr.mxu1 %v922_v1  ;;  %v155_v6 = vld [vmem:[%s1370_s3 + $0x68] sm:$0xff]  ;;  %v52_v7 = vld [vmem:[%s1368_s1] sm:$0xff]  ;;  %vm63_vm1 = vcmask 261120   ;;  %vm648_vm2 = vcmask 326656  }
   0x5   :  { %798 = vmatprep.subr.mxu0 %v922_v1  ;;  %808 = vmatpush3.msra.mxu1 %v156_v4  ;;  %v1037_v8 = vld [vmem:[%s1367_s0] sm:$0xff]  ;;  %v153_v10 = vld [vmem:[%s1370_s3 + $0x58] sm:$0xff]  ;;  %v152_v11 = vld [vmem:[%s1370_s3 + $0x50] sm:$0xff]  ;;  %s924_s0 = smov [#allocation2]  }
   0x6   :  { %799 = vmatpush3.msra.mxu0 %v53_v5  ;;  %809 = vmatprep.subr.mxu1 %v922_v1  ;;  %v154_v9 = vld [vmem:[%s1370_s3 + $0x60] sm:$0xff]  ;;  %v151_v12 = vld [vmem:[%s1370_s3 + $0x48] sm:$0xff]  ;;  %v149_v14 = vld [vmem:[%s1370_s3 + $0x38] sm:$0xff]  ;;  %s729_s1 = sshll.u32 %s924_s0, 4  ;;  %s730_s1 = int_to_ptr.vmem [resolvable:$true] %s729_s1 }
   0x7   :  { %800 = vmatprep.subr.mxu0 %v922_v1  ;;  %810 = vmatpush3.msra.mxu1 %v155_v6  ;;  %v150_v13 = vld [vmem:[%s1370_s3 + $0x40] sm:$0xff]  ;;  %v148_v15 = vld [vmem:[%s1370_s3 + $0x30] sm:$0xff]  ;;  %v147_v16 = vld [vmem:[%s1370_s3 + $0x28] sm:$0xff]  ;;  %p883_p1 = scmp.lt.s32.totalorder %s730_s1, %s730_s1 }
   0x8   :  { %801 = vmatpush3.msra.mxu0 %v52_v7  ;;  %811 = vmatprep.subr.mxu1 %v922_v1  ;;  %v146_v17 = vld [vmem:[%s1370_s3 + $0x20] sm:$0xff]  ;;  %v145_v18 = vld [vmem:[%s1370_s3 + $0x18] sm:$0xff]  ;;  %v144_v19 = vld [vmem:[%s1370_s3 + $0x10] sm:$0xff] }
   0x9   :  { %803 = vmatmul.mubr.msk.f32.vlgmr.msra.gmra.mxu0 %vm63_vm1, %v1037_v8  ;;  %812 = vmatpush3.msra.mxu1 %v154_v9  ;;  %v143_v20 = vld [vmem:[%s1370_s3 + $0x8] sm:$0xff]  ;;  %v142_v21 = vld [vmem:[%s1370_s3] sm:$0xff]  ;;  %v243_v31 = vld [vmem:[%s1372_s5 + $0x18] sm:$0xff] }
   0xa   :  { %813 = vmatprep.subr.mxu1 %v922_v1  ;;  %837 = vmatprep.mubr.msk.f32.mxu1 %vm923_vm0, %v922_v1  ;;  %v751_v22 = vld [vmem:[%s1369_s2] ss:$0 sm:$0xff]  ;;  %v242_v32 = vld [vmem:[%s1372_s5 + $0x10] sm:$0xff]  ;;  %v241_v33 = vld [vmem:[%s1372_s5 + $0x8] sm:$0xff] }
   0xb   :  { %840 = vmatprep.subr.mxu0 %v922_v1  ;;  %848 = vmatprep.mubr.msk.f32.mxu0 %vm923_vm0, %v922_v1  ;;  %v240_v34 = vld [vmem:[%s1372_s5] sm:$0xff]  ;;  %v364_v35 = vld [vmem:[%s1375_s8 + $0xf8] sm:$0xff]  ;;  %v363_v45 = vld [vmem:[%s1375_s8 + $0xf0] sm:$0xff] }
   0xc   :  { %814 = vmatpush3.msra.mxu1 %v153_v10  ;;  %841 = vmatpush3.msra.mxu0 %v243_v31  ;;  %v753_v36 = vld [vmem:[%s1371_s4] ss:$0 sm:$0xff]  ;;  %v362_v46 = vld [vmem:[%s1375_s8 + $0xe8] sm:$0xff]  ;;  %v360_v48 = vld [vmem:[%s1375_s8 + $0xd8] sm:$0xff] }
   0xd   :  { %815 = vmatprep.subr.mxu1 %v922_v1  ;;  %842 = vmatprep.subr.mxu0 %v922_v1  ;;  %v361_v47 = vld [vmem:[%s1375_s8 + $0xe0] sm:$0xff]  ;;  %v359_v49 = vld [vmem:[%s1375_s8 + $0xd0] sm:$0xff]  ;;  %v358_v50 = vld [vmem:[%s1375_s8 + $0xc8] sm:$0xff] }
   0xe   :  { %816 = vmatpush3.msra.mxu1 %v152_v11  ;;  %843 = vmatpush3.msra.mxu0 %v242_v32  ;;  %v357_v51 = vld [vmem:[%s1375_s8 + $0xc0] sm:$0xff]  ;;  %v356_v52 = vld [vmem:[%s1375_s8 + $0xb8] sm:$0xff]  ;;  %v355_v53 = vld [vmem:[%s1375_s8 + $0xb0] sm:$0xff] }
   0xf   :  { %817 = vmatprep.subr.mxu1 %v922_v1  ;;  %844 = vmatprep.subr.mxu0 %v922_v1  ;;  %v354_v54 = vld [vmem:[%s1375_s8 + $0xa8] sm:$0xff]  ;;  %v353_v55 = vld [vmem:[%s1375_s8 + $0xa0] sm:$0xff]  ;;  %v352_v56 = vld [vmem:[%s1375_s8 + $0x98] sm:$0xff] }
  0x10   :  { %818 = vmatpush3.msra.mxu1 %v151_v12  ;;  %845 = vmatpush3.msra.mxu0 %v241_v33  ;;  %v351_v57 = vld [vmem:[%s1375_s8 + $0x90] sm:$0xff]  ;;  %v350_v58 = vld [vmem:[%s1375_s8 + $0x88] sm:$0xff]  ;;  %v349_v59 = vld [vmem:[%s1375_s8 + $0x80] sm:$0xff] }
  0x11   :  { %819 = vmatprep.subr.mxu1 %v922_v1  ;;  %846 = vmatprep.subr.mxu0 %v922_v1  ;;  %v348_v60 = vld [vmem:[%s1375_s8 + $0x78] sm:$0xff]  ;;  %v347_v61 = vld [vmem:[%s1375_s8 + $0x70] sm:$0xff]  ;;  %v346_v62 = vld [vmem:[%s1375_s8 + $0x68] sm:$0xff] }
  0x12   :  { %820 = vmatpush3.msra.mxu1 %v150_v13  ;;  %847 = vmatpush3.msra.mxu0 %v240_v34  ;;  %v345_v63 = vld [vmem:[%s1375_s8 + $0x60] sm:$0xff]  ;;  %v344_v0 = vld [vmem:[%s1375_s8 + $0x58] sm:$0xff]  ;;  %v343_v2 = vld [vmem:[%s1375_s8 + $0x50] sm:$0xff] }
  0x13   :  { %821 = vmatprep.subr.mxu1 %v922_v1  ;;  %365 = vmatprep.subr.mxu0 %v364_v35  ;;  %v342_v3 = vld [vmem:[%s1375_s8 + $0x48] sm:$0xff]  ;;  %v341_v4 = vld [vmem:[%s1375_s8 + $0x40] sm:$0xff]  ;;  %v340_v5 = vld [vmem:[%s1375_s8 + $0x38] sm:$0xff] }
  0x14   :  { %822 = vmatpush3.msra.mxu1 %v149_v14  ;;  %v339_v6 = vld [vmem:[%s1375_s8 + $0x30] sm:$0xff]  ;;  %v338_v7 = vld [vmem:[%s1375_s8 + $0x28] sm:$0xff]  ;;  %v337_v9 = vld [vmem:[%s1375_s8 + $0x20] sm:$0xff] }
  0x15   :  { %823 = vmatprep.subr.mxu1 %v922_v1  ;;  %v336_v10 = vld [vmem:[%s1375_s8 + $0x18] sm:$0xff]  ;;  %v335_v11 = vld [vmem:[%s1375_s8 + $0x10] sm:$0xff]  ;;  %v334_v12 = vld [vmem:[%s1375_s8 + $0x8] sm:$0xff] }
  0x16   :  { %824 = vmatpush3.msra.mxu1 %v148_v15  ;;  %v333_v13 = vld [vmem:[%s1375_s8] sm:$0xff]  ;;  %v332_v14 = vld [vmem:[%s1374_s7 + $0x38] sm:$0xff]  ;;  %v540_v31 = vld [vmem:[%s1377_s10 + $0x48] sm:$0xff] }
  0x17   :  { %825 = vmatprep.subr.mxu1 %v922_v1  ;;  %v546_v15 = vld [vmem:[%s1377_s10 + $0x78] sm:$0xff]  ;;  %v539_v32 = vld [vmem:[%s1377_s10 + $0x40] sm:$0xff]  ;;  %v537_v34 = vld [vmem:[%s1377_s10 + $0x30] sm:$0xff] }
  0x18   :  { %826 = vmatpush3.msra.mxu1 %v147_v16  ;;  %v545_v16 = vld [vmem:[%s1377_s10 + $0x70] sm:$0xff]  ;;  %v538_v33 = vld [vmem:[%s1377_s10 + $0x38] sm:$0xff]  ;;  %v536_v35 = vld [vmem:[%s1377_s10 + $0x28] sm:$0xff] }
  0x19   :  { %827 = vmatprep.subr.mxu1 %v922_v1 }
  0x1a   :  { %828 = vmatpush3.msra.mxu1 %v146_v17  ;;  %v754_v17 = vld [vmem:[%s1373_s6] ss:$0 sm:$0xff] }
  0x1b   :  { %829 = vmatprep.subr.mxu1 %v922_v1 }
  0x1c   :  { %830 = vmatpush3.msra.mxu1 %v145_v18 }
  0x1d   :  { %831 = vmatprep.subr.mxu1 %v922_v1 }
  0x1e   :  { %832 = vmatpush3.msra.mxu1 %v144_v19 }
  0x1f   :  { %833 = vmatprep.subr.mxu1 %v922_v1 }
  0x20   :  { %834 = vmatpush3.msra.mxu1 %v143_v20  ;;  %v331_v20 = vld [vmem:[%s1374_s7 + $0x30] sm:$0xff] }
  0x21   :  { %835 = vmatprep.subr.mxu1 %v922_v1 }
  0x22   :  { %836 = vmatpush3.msra.mxu1 %v142_v21 }
  0x23   :  { %561 = vmatprep.subr.mxu1 %v922_v1 }
  0xc9   :  { %v133_v23 = vpop.f32.mrf.mxu0 }
  0xca   :  { %v134_v24 = vadd.f32 %v751_v22, %v133_v23  ;;  %v330_v22 = vld [vmem:[%s1374_s7 + $0x28] sm:$0xff]  ;;  %v329_v23 = vld [vmem:[%s1374_s7 + $0x20] sm:$0xff] }
  0xcb   :  { %v804_v25 = vpop.f32.mrf.mxu0 }
  0xcc   :  { %v138_v26 = vmul.f32 0.70710677, %v134_v24  ;;  %v137_v28 = vmul.f32 0.5, %v134_v24  ;;  %v328_v24 = vld [vmem:[%s1374_s7 + $0x18] sm:$0xff]  ;;  %v327_v25 = vld [vmem:[%s1374_s7 + $0x10] sm:$0xff] }
  0xce   :  { %868 = verf.f32 %v138_v26  ;;  %v326_v26 = vld [vmem:[%s1374_s7 + $0x8] sm:$0xff] }
  0xdb   :  { %v869_v27 = vpop.eup %868 }
  0xdc   :  { %v140_v29 = vadd.f32 1.0, %v869_v27  ;;  %v325_v27 = vld [vmem:[%s1374_s7] sm:$0xff] }
  0xde   :  { %v141_v30 = vmul.f32 %v140_v29, %v137_v28  ;;  %v544_v28 = vld [vmem:[%s1377_s10 + $0x68] sm:$0xff]  ;;  %v543_v29 = vld [vmem:[%s1377_s10 + $0x60] sm:$0xff] }
  0xe0   :  { %838 = vmatmul.mubr.f32.vlgmr.msra.gmra.mxu1 %v141_v30  ;;  %v541_v30 = vld [vmem:[%s1377_s10 + $0x50] sm:$0xff] }
  0xe1   :  { %562 = vmatpush1.msra.mxu1 %v546_v15 }
  0xe2   :  { %563 = vmatprep.subr.mxu1 %v922_v1 }
  0xe3   :  { %564 = vmatpush1.msra.mxu1 %v545_v16 }
  0xe4   :  { %565 = vmatprep.subr.mxu1 %v922_v1 }
  0xe5   :  { %566 = vmatpush1.msra.mxu1 %v544_v28 }
  0xe6   :  { %567 = vmatprep.subr.mxu1 %v922_v1 }
  0xe7   :  { %568 = vmatpush1.msra.mxu1 %v543_v29 }
  0xe8   :  { %569 = vmatprep.subr.mxu1 %v922_v1 }
 0x1a0   :  { %v231_v37 = vpop.f32.mrf.mxu1 }
 0x1a1   :  { %v232_v38 = vadd.f32 %v753_v36, %v231_v37  ;;  %v535_v36 = vld [vmem:[%s1377_s10 + $0x20] sm:$0xff]  ;;  %v534_v37 = vld [vmem:[%s1377_s10 + $0x18] sm:$0xff] }
 0x1a2   :  { %v839_v39 = vpop.f32.mrf.mxu1 }
 0x1a3   :  { %v236_v40 = vmul.f32 0.70710677, %v232_v38  ;;  %v235_v42 = vmul.f32 0.5, %v232_v38  ;;  %v533_v38 = vld [vmem:[%s1377_s10 + $0x10] sm:$0xff]  ;;  %v532_v39 = vld [vmem:[%s1377_s10 + $0x8] sm:$0xff] }
 0x1a5   :  { %870 = verf.f32 %v236_v40  ;;  %v531_v40 = vld [vmem:[%s1377_s10] sm:$0xff] }
 0x1b2   :  { %v871_v41 = vpop.eup %870 }
 0x1b3   :  { %v238_v43 = vadd.f32 1.0, %v871_v41  ;;  %v550_v41 = vld [vmem:[%s1377_s10 + $0x98] sm:$0xff] }
 0x1b5   :  { %v239_v44 = vmul.f32 %v238_v43, %v235_v42  ;;  %v549_v42 = vld [vmem:[%s1377_s10 + $0x90] sm:$0xff]  ;;  %v548_v43 = vld [vmem:[%s1377_s10 + $0x88] sm:$0xff] }
 0x1b7   :  { %849 = vmatmul.mubr.msk.f32.vlgmr.msra.gmra.mxu0 %vm63_vm1, %v239_v44  ;;  %v547_v44 = vld [vmem:[%s1377_s10 + $0x80] sm:$0xff] }
 0x1b8   :  { %366 = vmatpush1.msra.mxu0 %v363_v45  ;;  %429 = vmatprep.mubr.f32.mxu0 %v922_v1  ;;  %v509_v45 = vlaneseq }
 0x1b9   :  { %367 = vmatprep.subr.mxu0 %v362_v46 }
 0x1ba   :  { %368 = vmatpush1.msra.mxu0 %v361_v47  ;;  %v510_v46 = vshrl.u32 %v509_v45, 7 }
 0x1bb   :  { %369 = vmatprep.subr.mxu0 %v360_v48 }
 0x1bc   :  { %370 = vmatpush1.msra.mxu0 %v359_v49  ;;  %v511_v48 = vsub.s32 0, %v510_v46  ;;  %v507_v49 = vld [vmem:[%s1376_s9] sm:$0x3] }
 0x1bd   :  { %371 = vmatprep.subr.mxu0 %v358_v50  ;;  %v515_v50 = vsub.s32 1, %v510_v46 }
 0x1be   :  { %372 = vmatpush1.msra.mxu0 %v357_v51 }
 0x1bf   :  { %373 = vmatprep.subr.mxu0 %v356_v52  ;;  %v512_v52 = vrot.slane %v507_v49, %v511_v48 }
 0x1c0   :  { %374 = vmatpush1.msra.mxu0 %v355_v53 }
 0x1c1   :  { %375 = vmatprep.subr.mxu0 %v354_v54 }
 0x1c2   :  { %376 = vmatpush1.msra.mxu0 %v353_v55  ;;  %v516_v55 = vrot.slane %v507_v49, %v515_v50 }
 0x1c3   :  { %377 = vmatprep.subr.mxu0 %v352_v56 }
 0x1c4   :  { %378 = vmatpush1.msra.mxu0 %v351_v57 }
 0x1c5   :  { %379 = vmatprep.subr.mxu0 %v350_v58 }
 0x1c6   :  { %380 = vmatpush1.msra.mxu0 %v349_v59 }
 0x1c7   :  { %381 = vmatprep.subr.mxu0 %v348_v60 }
 0x1c8   :  { %382 = vmatpush1.msra.mxu0 %v347_v61 }
 0x1c9   :  { %383 = vmatprep.subr.mxu0 %v346_v62 }
 0x1ca   :  { %384 = vmatpush1.msra.mxu0 %v345_v63 }
 0x1cb   :  { %385 = vmatprep.subr.mxu0 %v344_v0 }
 0x1cc   :  { %386 = vmatpush1.msra.mxu0 %v343_v2 }
 0x1cd   :  { %387 = vmatprep.subr.mxu0 %v342_v3 }
 0x1ce   :  { %388 = vmatpush1.msra.mxu0 %v341_v4 }
 0x1cf   :  { %389 = vmatprep.subr.mxu0 %v340_v5 }
 0x1d0   :  { %390 = vmatpush1.msra.mxu0 %v339_v6 }
 0x1d1   :  { %391 = vmatprep.subr.mxu0 %v338_v7  ;;  %v640_v7 = vld [vmem:[%s1379_s12 + $0x20] sm:$0xff] }
 0x1d2   :  { %392 = vmatpush1.msra.mxu0 %v337_v9  ;;  %v639_v9 = vld [vmem:[%s1379_s12 + $0x18] sm:$0xff] }
 0x1d3   :  { %393 = vmatprep.subr.mxu0 %v336_v10  ;;  %v638_v10 = vld [vmem:[%s1379_s12 + $0x10] sm:$0xff] }
 0x1d4   :  { %394 = vmatpush1.msra.mxu0 %v335_v11  ;;  %v637_v11 = vld [vmem:[%s1379_s12 + $0x8] sm:$0xff] }
 0x1d5   :  { %395 = vmatprep.subr.mxu0 %v334_v12  ;;  %v636_v12 = vld [vmem:[%s1379_s12] sm:$0xff]  ;;  %s878_s12 = scalar_lea.vmem %s730_s1, 128 }
 0x1d6   :  { %396 = vmatpush1.msra.mxu0 %v333_v13  ;;  %v757_v13 = vld [vmem:[%s1378_s11] ss:$0 sm:$0xff]  ;;  %p879_p0 = scmp.ne.s32.totalorder %s730_s1, %s878_s12  ;;  %p884_p2 = scmp.lt.s32.totalorder %s878_s12, %s878_s12 }
 0x1d7   :  { %460 = vmatprep.subr.mxu0 %v332_v14 }
 0x1d8   :  { %p885_p3 = por %p884_p2, %p883_p1 }
 0x1da   :  { %p886_p4 = pnand %p885_p3, %p879_p0 }
 0x277   :  { %v320_v18 = vpop.f32.mrf.mxu0 }
 0x278   :  { %v321_v19 = vadd.f32 %v754_v17, %v320_v18 }
 0x279   :  { %v850_v21 = vpop.f32.mrf.mxu0 }
 0x27a   :  { %324 = vst [vmem:[#allocation2] sm:$0xff] %v321_v19  ;;  %430 = vmatmul.mubr.f32.vlgmr.msra.gmra.mxu0 %v321_v19 }
 0x27b   :  { %461 = vmatpush1.msra.mxu0 %v331_v20  ;;  %500 = vmatprep.mubr.f32.mxu0 %v922_v1 }
 0x27c   :  { %462 = vmatprep.subr.mxu0 %v330_v22 }
 0x27d   :  { %463 = vmatpush1.msra.mxu0 %v329_v23 }
 0x27e   :  { %464 = vmatprep.subr.mxu0 %v328_v24 }
 0x27f   :  { %465 = vmatpush1.msra.mxu0 %v327_v25 }
 0x280   :  { %466 = vmatprep.subr.mxu0 %v326_v26 }
 0x281   :  { %467 = vmatpush1.msra.mxu0 %v325_v27 }
 0x282   :  { %756 = vmatmul.mubr.msk.f32.vlgmr.msra.gmra.mxu0 %vm63_vm1, %v1037_v8  ;;  %851 = vmatprep.subr.mxu0 %v922_v1  ;;  %v542_v8 = vld [vmem:[%s1377_s10 + $0x58] sm:$0xff] }
 0x283   :  { %861 = vmatprep.mubr.msk.f32.mxu0 %vm923_vm0, %v922_v1  ;;  %570 = vmatpush1.msra.mxu1 %v542_v8 }
 0x284   :  { %571 = vmatprep.subr.mxu1 %v922_v1  ;;  %852 = vmatpush3.msra.mxu0 %v640_v7 }
 0x285   :  { %572 = vmatpush1.msra.mxu1 %v541_v30  ;;  %853 = vmatprep.subr.mxu0 %v922_v1 }
 0x286   :  { %573 = vmatprep.subr.mxu1 %v922_v1  ;;  %854 = vmatpush3.msra.mxu0 %v639_v9 }
 0x287   :  { %574 = vmatpush1.msra.mxu1 %v540_v31  ;;  %855 = vmatprep.subr.mxu0 %v922_v1 }
 0x288   :  { %575 = vmatprep.subr.mxu1 %v922_v1  ;;  %856 = vmatpush3.msra.mxu0 %v638_v10 }
 0x289   :  { %576 = vmatpush1.msra.mxu1 %v539_v32  ;;  %857 = vmatprep.subr.mxu0 %v922_v1 }
 0x28a   :  { %577 = vmatprep.subr.mxu1 %v922_v1  ;;  %858 = vmatpush3.msra.mxu0 %v637_v11 }
 0x28b   :  { %578 = vmatpush1.msra.mxu1 %v538_v33  ;;  %859 = vmatprep.subr.mxu0 %v922_v1 }
 0x28c   :  { %579 = vmatprep.subr.mxu1 %v922_v1  ;;  %860 = vmatpush3.msra.mxu0 %v636_v12 }
 0x28d   :  { %580 = vmatpush1.msra.mxu1 %v537_v34 }
 0x28e   :  { %581 = vmatprep.subr.mxu1 %v922_v1 }
 0x28f   :  { %582 = vmatpush1.msra.mxu1 %v536_v35 }
 0x290   :  { %583 = vmatprep.subr.mxu1 %v922_v1 }
 0x291   :  { %584 = vmatpush1.msra.mxu1 %v535_v36 }
 0x292   :  { %585 = vmatprep.subr.mxu1 %v922_v1 }
 0x293   :  { %586 = vmatpush1.msra.mxu1 %v534_v37 }
 0x294   :  { %587 = vmatprep.subr.mxu1 %v922_v1 }
 0x295   :  { %588 = vmatpush1.msra.mxu1 %v533_v38 }
 0x296   :  { %589 = vmatprep.subr.mxu1 %v922_v1 }
 0x297   :  { %590 = vmatpush1.msra.mxu1 %v532_v39 }
 0x298   :  { %591 = vmatprep.subr.mxu1 %v922_v1 }
 0x299   :  { %592 = vmatpush1.msra.mxu1 %v531_v40 }
 0x29a   :  { %617 = vmatprep.subr.mxu1 %v922_v1 }
 0x29b   :  { %618 = vmatpush2.msra.mxu1 %v550_v41 }
 0x29c   :  { %619 = vmatprep.subr.mxu1 %v922_v1 }
 0x29d   :  { %620 = vmatpush2.msra.mxu1 %v549_v42 }
 0x29e   :  { %621 = vmatprep.subr.mxu1 %v922_v1 }
 0x29f   :  { %622 = vmatpush2.msra.mxu1 %v548_v43 }
 0x2a0   :  { %623 = vmatprep.subr.mxu1 %v922_v1 }
 0x2a1   :  { %624 = vmatpush2.msra.mxu1 %v547_v44 }
 0x33a   :  { %v431_v47 = vpop.f32.mrf.mxu0 }
 0x33c   :  { %v433_v51 = vpop.f32.mrf.mxu0 }
 0x342   :  { %v502_v53 = vpop.f32.mrf.mxu0 }
 0x343   :  { %v503_v54 = vadd.f32 %v502_v53, %v431_v47 }
 0x344   :  { %v504_v56 = vpop.f32.mrf.mxu0 }
 0x345   :  { %v519_v57 = vadd.f32 %v512_v52, %v503_v54  ;;  %v505_v58 = vadd.f32 %v504_v56, %v433_v51 }
 0x347   :  { %v523_v59 = vmul.f32 0.70710677, %v519_v57  ;;  %v520_v60 = vadd.f32 %v516_v55, %v505_v58  ;;  %v521_v4 = vmul.f32 0.5, %v519_v57 }
 0x349   :  { %872 = verf.f32 %v523_v59  ;;  %v524_v61 = vmul.f32 0.70710677, %v520_v60  ;;  %v522_v2 = vmul.f32 0.5, %v520_v60 }
 0x34b   :  { %874 = verf.f32 %v524_v61 }
 0x356   :  { %v873_v62 = vpop.eup %872 }
 0x357   :  { %v527_v0 = vadd.f32 1.0, %v873_v62 }
 0x358   :  { %v875_v63 = vpop.eup %874 }
 0x359   :  { %v528_v3 = vadd.f32 1.0, %v875_v63  ;;  %v529_v6 = vmul.f32 %v527_v0, %v521_v4 }
 0x35b   :  { %v530_v5 = vmul.f32 %v528_v3, %v522_v2 }
 0x35d   :  { %758 = vmatprep.mubr.msk.f32.mxu1 %vm63_vm1, %v530_v5 }
 0x35e   :  { %626 = vmatmul.mubr.f32.vlgmr.msra.gmra.mxu1 %v529_v6 }
 0x41e   :  { %v627_v14 = vpop.f32.mrf.mxu1 }
 0x41f   :  { %v628_v15 = vadd.f32 %v757_v13, %v627_v14 }
 0x420   :  { %v629_v16 = vpop.f32.mrf.mxu1 }
 0x421   :  { %v632_v17 = vmul.f32 0.70710677, %v628_v15  ;;  %v631_v19 = vmul.f32 0.5, %v628_v15 }
 0x423   :  { %876 = verf.f32 %v632_v17 }
 0x430   :  { %v877_v18 = vpop.eup %876 }
 0x431   :  { %v634_v20 = vadd.f32 1.0, %v877_v18 }
 0x433   :  { %v635_v21 = vmul.f32 %v634_v20, %v631_v19 }
 0x435   :  { %862 = vmatmul.mubr.msk.f32.vlgmr.msra.gmra.mxu0 %vm648_vm2, %v635_v21 }
 0x436   :  { %889 = shalt.err (!%p886_p4)
}
 0x437   :  { %732 = dma.vmem_to_hbm [thread:$0]  %s730_s1, 128, %s1381_s14, [#allocation3]   ;;  %v759_v1 = vld [vmem:[%s1380_s13] ss:$0 sm:$0xff] }
 0x438   :  { %s925_s22 = smov [#allocation4]  }
 0x439   :  { %s739_s23 = sshll.u32 %s925_s22, 4  ;;  %s740_s23 = int_to_ptr.vmem [resolvable:$true] %s739_s23 }
 0x43a   :  { %s898_s4 = scalar_lea.vmem %s740_s23, 128  ;;  %p903_p6 = scmp.lt.s32.totalorder %s740_s23, %s740_s23 }
 0x43b   :  { %p899_p5 = scmp.ne.s32.totalorder %s740_s23, %s898_s4  ;;  %p904_p7 = scmp.lt.s32.totalorder %s898_s4, %s898_s4 }
 0x43d   :  { %p905_p8 = por %p904_p7, %p903_p6 }
 0x43f   :  { %p906_p9 = pnand %p905_p8, %p899_p5 }
 0x4f5   :  { %v718_v22 = vpop.f32.mrf.mxu0 }
 0x4f6   :  { %v719_v23 = vadd.f32 %v759_v1, %v718_v22 }
 0x4f7   :  { %v863_v24 = vpop.f32.mrf.mxu0 }
 0x4f8   :  { %722 = vst [vmem:[#allocation4] sm:$0xff] %v719_v23 }
 0x4f9   :  { %909 = shalt.err (!%p906_p9)
}
 0x4fa   :  { %742 = dma.vmem_to_hbm [thread:$0]  %s740_s23, 128, %s1382_s15, [#allocation5]  }
 0x4fb   :  { %918 = dma.done.wait [#allocation3], 128  }
 0x4fc   :  { %919 = vsyncadd [#allocation3], 4294967168 }
 0x4fd   :  { %920 = dma.done.wait [#allocation5], 128  }
 0x4fe   :  { %921 = vsyncadd [#allocation5], 4294967168 }
 0x4ff   :  { %749 = vsyncpa [#allocation3], 1 }
 0x500   :  { %750 = vsyncpa [#allocation5], 1 }

</bundles_post_ra>
